<compile_context>
chip_gen: v7x
topology: tpu7x:2x2x1
jax: 0.10.0
libtpu: 0.0.40
codegen_flags: <defaults>
</compile_context>

<pallas_src>
import jax
import jax.numpy as jnp
from jax import lax
from jax.experimental import pallas as pl
from jax.experimental.pallas import tpu as pltpu


_NEG_BIG = -1e30  # finite "-inf" for padded logit lanes (avoids inf-inf NaN risk)


def _mlp_softmax_kernel(x_ref, w1_ref, b1_ref, w2_ref, b2_ref, o_ref):
    """One batch tile: (TB, in_dim) bf16 -> (TB, out_p) f32 softmax probs."""
    x = x_ref[...]                                           # (TB, in_dim) bf16

    # h = x @ w1.T : contract dim 1 of x with dim 1 of w1 (PyTorch (out,in) layout).
    h = lax.dot_general(
        x, w1_ref[...],
        dimension_numbers=(((1,), (1,)), ((), ())),
        preferred_element_type=jnp.float32)                  # (TB, hidden) f32
    h = jnp.maximum(h + b1_ref[...], 0.0)                    # bias + ReLU in f32

    # logits = h @ w2.T ; padded w2 rows are zero, padded bias lanes are -1e30.
    logits = lax.dot_general(
        h.astype(jnp.bfloat16), w2_ref[...],
        dimension_numbers=(((1,), (1,)), ((), ())),
        preferred_element_type=jnp.float32)                  # (TB, out_p) f32
    logits = logits + b2_ref[...]

    # Numerically-stable softmax over the lane-dense (padded) class axis.
    m = jnp.max(logits, axis=1, keepdims=True)
    e = jnp.exp(logits - m)                                  # padded lanes -> 0
    denom = jnp.sum(e, axis=1, keepdims=True)
    o_ref[...] = (e * pl.reciprocal(denom, approx=True)).astype(o_ref.dtype)


def _round_up(n, m):
    return (n + m - 1) // m * m


def _pick_batch_tile(b_rows, in_dim, out_p, hidden):
    """Largest batch tile (multiple of 8 sublanes, <=512) fitting the VMEM budget."""
    budget = 20 * 1024 * 1024                       # headroom under 32 MiB scoped VMEM
    resident = 2 * (hidden * in_dim * 2 + out_p * hidden * 2)   # bf16 weights, x2 buffers
    resident += 2 * 4 * (hidden + out_p)                        # f32 biases
    per_row = 2 * in_dim * 2 + 2 * out_p * 4        # double-buffered bf16 x + f32 out
    avail = max(budget - resident, 8 * per_row)
    tb = max(8, (avail // per_row) // 8 * 8)
    return int(min(b_rows, 512, tb))


def audio_video_classifier(x, w1, b1, w2, b2):
    """Pallas equivalent of AudioVideoClassifier.forward.

    x:  (B, *) any trailing dims -> flattened to (B, input_dim)
    w1: (hidden_dim, input_dim)   PyTorch nn.Linear weight layout
    b1: (hidden_dim,)
    w2: (output_dim, hidden_dim)
    b2: (output_dim,)
    returns (B, output_dim) float32 softmax probabilities.
    """
    B = x.shape[0]
    x_flat = x.reshape(B, -1)
    in_dim = x_flat.shape[1]
    hidden_dim = w1.shape[0]
    out_dim = w2.shape[0]

    # NOTE: at tiny B (like the test) this op is pure launch overhead and could be
    # left to XLA fusion; the kernel is structured for real classifier batches.

    # Lane-dense class axis: pad out_dim up to a multiple of 128.
    out_p = _round_up(max(out_dim, 1), 128)

    # Batch tiling: tile is a multiple of 8 sublanes; pad B so the grid divides evenly.
    b8 = _round_up(B, 8)
    tb = _pick_batch_tile(b8, in_dim, out_p, hidden_dim)
    b_pad = _round_up(B, tb)

    # bf16 matmul operands (halves HBM/VMEM traffic; f32 accumulation in-kernel).
    x_bf = x_flat.astype(jnp.bfloat16)
    if b_pad != B:
        x_bf = jnp.pad(x_bf, ((0, b_pad - B), (0, 0)))

    w1_bf = w1.astype(jnp.bfloat16)                  # keep (hidden, in) layout, no transpose
    w2_bf = jnp.pad(w2.astype(jnp.bfloat16), ((0, out_p - out_dim), (0, 0)))
    b1_2d = b1.reshape(1, hidden_dim).astype(jnp.float32)
    b2_2d = jnp.pad(b2.reshape(1, out_dim).astype(jnp.float32),
                    ((0, 0), (0, out_p - out_dim)),
                    constant_values=_NEG_BIG)

    grid = (b_pad // tb,)
    out = pl.pallas_call(
        _mlp_softmax_kernel,
        out_shape=jax.ShapeDtypeStruct((b_pad, out_p), jnp.float32),
        grid=grid,
        in_specs=[
            pl.BlockSpec((tb, in_dim), lambda i: (i, 0)),            # batch-tiled x
            pl.BlockSpec((hidden_dim, in_dim), lambda i: (0, 0)),    # resident w1
            pl.BlockSpec((1, hidden_dim), lambda i: (0, 0)),         # resident b1
            pl.BlockSpec((out_p, hidden_dim), lambda i: (0, 0)),     # resident w2 (padded)
            pl.BlockSpec((1, out_p), lambda i: (0, 0)),              # resident b2 (padded)
        ],
        out_specs=pl.BlockSpec((tb, out_p), lambda i: (i, 0)),
        compiler_params=pltpu.CompilerParams(
            dimension_semantics=("parallel",),         # megacore / v7x dual-TC batch split
            vmem_limit_bytes=32 * 1024 * 1024),
    )(x_bf, w1_bf, b1_2d, w2_bf, b2_2d)

    return out[:B, :out_dim]


if __name__ == "__main__":
    # Small shapes consistent with the module: vector_final (B, 4, 16) -> input_dim 64.
    B = 2
    input_dim = 64
    hidden_dim = 32
    output_dim = 8

    key = jax.random.PRNGKey(0)
    kx, kw1, kb1, kw2, kb2 = jax.random.split(key, 5)

    x = jax.random.normal(kx, (B, 4, 16), dtype=jnp.float32)
    # PyTorch nn.Linear weight layout: (out_features, in_features).
    w1 = jax.random.normal(kw1, (hidden_dim, input_dim), dtype=jnp.float32) * 0.1
    b1 = jax.random.normal(kb1, (hidden_dim,), dtype=jnp.float32) * 0.1
    w2 = jax.random.normal(kw2, (output_dim, hidden_dim), dtype=jnp.float32) * 0.1
    b2 = jax.random.normal(kb2, (output_dim,), dtype=jnp.float32) * 0.1

    probs = audio_video_classifier(x, w1, b1, w2, b2)
    probs = jax.block_until_ready(probs)

    # Plain-JAX f32 reference (same math as the PyTorch module). Tolerances account
    # for bf16 MXU operands and the approx EUP reciprocal in the kernel.
    x_flat = x.reshape(B, -1)
    h_ref = jnp.maximum(x_flat @ w1.T + b1, 0.0)
    logits_ref = h_ref @ w2.T + b2
    ref = jax.nn.softmax(logits_ref, axis=1)

    assert probs.shape == (B, output_dim)
    assert bool(jnp.all(jnp.isfinite(probs)))
    assert jnp.allclose(probs, ref, atol=2e-2, rtol=2e-2)
    assert jnp.allclose(jnp.sum(probs, axis=1), 1.0, atol=5e-3)

    print("KERNEL_OK")
</pallas_src>

<mosaic_0001>
module attributes {stable_mosaic.version = 11 : i64} {
  func.func @_mlp_softmax_kernel(%arg0: i32, %arg1: memref<8x64xbf16, #tpu.memory_space<vmem>>, %arg2: memref<32x64xbf16, #tpu.memory_space<vmem>>, %arg3: memref<1x32xf32, #tpu.memory_space<vmem>>, %arg4: memref<128x32xbf16, #tpu.memory_space<vmem>>, %arg5: memref<1x128xf32, #tpu.memory_space<vmem>>, %arg6: memref<8x128xf32, #tpu.memory_space<vmem>>) attributes {dimension_semantics = [#tpu.dimension_semantics<parallel>], iteration_bounds = array<i64: 1>, scalar_prefetch = 0 : i64, scratch_operands = 0 : i64, tpu.core_type = #tpu.core_type<tc>, window_params = [{transform_indices = @transform_0, window_bounds = array<i64: 8, 64>}, {pipeline_mode = #tpu.pipeline_mode<synchronous>, transform_indices = @transform_1, window_bounds = array<i64: 32, 64>}, {pipeline_mode = #tpu.pipeline_mode<synchronous>, transform_indices = @transform_2, window_bounds = array<i64: 1, 32>}, {pipeline_mode = #tpu.pipeline_mode<synchronous>, transform_indices = @transform_3, window_bounds = array<i64: 128, 32>}, {pipeline_mode = #tpu.pipeline_mode<synchronous>, transform_indices = @transform_4, window_bounds = array<i64: 1, 128>}, {transform_indices = @transform_5, window_bounds = array<i64: 8, 128>}]} {
    %c0 = arith.constant 0 : index
    %c0_0 = arith.constant 0 : index
    %0 = vector.load %arg1[%c0, %c0_0] : memref<8x64xbf16, #tpu.memory_space<vmem>>, vector<8x64xbf16>
    %c0_1 = arith.constant 0 : index
    %c0_2 = arith.constant 0 : index
    %1 = vector.load %arg2[%c0_1, %c0_2] : memref<32x64xbf16, #tpu.memory_space<vmem>>, vector<32x64xbf16>
    %cst = arith.constant dense<0.000000e+00> : vector<8x32xf32>
    %2 = tpu.matmul %0, %1, %cst {dimension_numbers = #tpu.dot_dimension_numbers<[1], [1], [0], [0], [0, 0, 1, 0], [], []>} : vector<8x64xbf16>, vector<32x64xbf16>, vector<8x32xf32> -> vector<8x32xf32>
    %c0_3 = arith.constant 0 : index
    %c0_4 = arith.constant 0 : index
    %3 = vector.load %arg3[%c0_3, %c0_4] : memref<1x32xf32, #tpu.memory_space<vmem>>, vector<1x32xf32>
    %4 = vector.broadcast %3 : vector<1x32xf32> to vector<8x32xf32>
    %5 = arith.addf %2, %4 : vector<8x32xf32>
    %cst_5 = arith.constant 0.000000e+00 : f32
    %6 = vector.broadcast %cst_5 : f32 to vector<8x32xf32>
    %7 = arith.maximumf %5, %6 : vector<8x32xf32>
    %8 = arith.truncf %7 : vector<8x32xf32> to vector<8x32xbf16>
    %c0_6 = arith.constant 0 : index
    %c0_7 = arith.constant 0 : index
    %9 = vector.load %arg4[%c0_6, %c0_7] : memref<128x32xbf16, #tpu.memory_space<vmem>>, vector<128x32xbf16>
    %cst_8 = arith.constant dense<0.000000e+00> : vector<8x128xf32>
    %10 = tpu.matmul %8, %9, %cst_8 {dimension_numbers = #tpu.dot_dimension_numbers<[1], [1], [0], [0], [0, 0, 1, 0], [], []>} : vector<8x32xbf16>, vector<128x32xbf16>, vector<8x128xf32> -> vector<8x128xf32>
    %c0_9 = arith.constant 0 : index
    %c0_10 = arith.constant 0 : index
    %11 = vector.load %arg5[%c0_9, %c0_10] : memref<1x128xf32, #tpu.memory_space<vmem>>, vector<1x128xf32>
    %12 = vector.broadcast %11 : vector<1x128xf32> to vector<8x128xf32>
    %13 = arith.addf %10, %12 : vector<8x128xf32>
    %cst_11 = arith.constant dense<0xFF800000> : vector<8xf32>
    %14 = vector.multi_reduction <maximumf>, %13, %cst_11 [1] : vector<8x128xf32> to vector<8xf32>
    %15 = vector.shape_cast %14 : vector<8xf32> to vector<8x1xf32>
    %16 = vector.broadcast %15 : vector<8x1xf32> to vector<8x128xf32>
    %17 = arith.subf %13, %16 : vector<8x128xf32>
    %18 = math.exp %17 : vector<8x128xf32>
    %cst_12 = arith.constant dense<0.000000e+00> : vector<8xf32>
    %19 = vector.multi_reduction <add>, %18, %cst_12 [1] : vector<8x128xf32> to vector<8xf32>
    %20 = vector.shape_cast %19 : vector<8xf32> to vector<8x1xf32>
    %21 = tpu.reciprocal %20 {approx = true} : vector<8x1xf32> -> vector<8x1xf32>
    %22 = vector.broadcast %21 : vector<8x1xf32> to vector<8x128xf32>
    %23 = arith.mulf %18, %22 : vector<8x128xf32>
    %c0_13 = arith.constant 0 : index
    %c0_14 = arith.constant 0 : index
    %24 = vector.load %arg6[%c0_13, %c0_14] : memref<8x128xf32, #tpu.memory_space<vmem>>, vector<8x128xf32>
    tpu.vector_store %arg6[%c0_13, %c0_14], %23 {strides = array<i32>} : memref<8x128xf32, #tpu.memory_space<vmem>>, vector<8x128xf32>,
    return
  }
  func.func @transform_0(%arg0: i32) -> (i32, i32) {
    %c0_i32 = arith.constant 0 : i32
    %c0_i32_0 = arith.constant 0 : i32
    return %arg0, %c0_i32 : i32, i32
  }
  func.func @transform_1(%arg0: i32) -> (i32, i32) {
    %c0_i32 = arith.constant 0 : i32
    %c0_i32_0 = arith.constant 0 : i32
    %c0_i32_1 = arith.constant 0 : i32
    return %c0_i32, %c0_i32_0 : i32, i32
  }
  func.func @transform_2(%arg0: i32) -> (i32, i32) {
    %c0_i32 = arith.constant 0 : i32
    %c0_i32_0 = arith.constant 0 : i32
    %c0_i32_1 = arith.constant 0 : i32
    return %c0_i32, %c0_i32_0 : i32, i32
  }
  func.func @transform_3(%arg0: i32) -> (i32, i32) {
    %c0_i32 = arith.constant 0 : i32
    %c0_i32_0 = arith.constant 0 : i32
    %c0_i32_1 = arith.constant 0 : i32
    return %c0_i32, %c0_i32_0 : i32, i32
  }
  func.func @transform_4(%arg0: i32) -> (i32, i32) {
    %c0_i32 = arith.constant 0 : i32
    %c0_i32_0 = arith.constant 0 : i32
    %c0_i32_1 = arith.constant 0 : i32
    return %c0_i32, %c0_i32_0 : i32, i32
  }
  func.func @transform_5(%arg0: i32) -> (i32, i32) {
    %c0_i32 = arith.constant 0 : i32
    %c0_i32_0 = arith.constant 0 : i32
    return %arg0, %c0_i32 : i32, i32
  }
}

</mosaic_0001>

<bundles_post_ra>
// kernel: tpu_custom_call.1
= control target key start
LH: loop header
LB: loop body
LE: loop exit
PB: predicated region body
PF: predicated region fallthrough
CT: control target
= control target key end

     0   :  { %v346_v1 = vmov 0.0   ;;  %vm44_vm0 = vcmask 523264   ;;  %vm347_vm1 = vmmov 0   ;;  %vm159_vm2 = vcmask 261120   ;;  %s442_s0 = inlined_call_operand.vmem [shape: bf16[8,64], index: 0, kind: input, shape index: {}]   ;;  %s443_s1 = inlined_call_operand.vmem [shape: bf16[32,64], index: 1, kind: input, shape index: {}]   ;;  %s444_s2 = inlined_call_operand.vmem [shape: f32[1,32], index: 2, kind: input, shape index: {}]   ;;  %s445_s3 = inlined_call_operand.vmem [shape: bf16[128,32], index: 3, kind: input, shape index: {}]   ;;  %s446_s4 = inlined_call_operand.vmem [shape: f32[1,128], index: 4, kind: input, shape index: {}]   ;;  %s447_s5 = inlined_call_operand.hbm [shape: f32[8,128], index: 5, kind: output, shape index: {}]  }
   0x1   :  { %v308_v0 = vld [vmem:[%s443_s1] sm:$0xff]   ;;  %277 = vmatprep.subr.bf16.mxu0 %v346_v1  ;;  %285 = vmatprep.subr.bf16.mxu1 %v346_v1  ;;  %v309_v3 = vld [vmem:[%s443_s1 + $0x8] sm:$0xff]  }
   0x2   :  { %v49_v2 = vsel %vm44_vm0, %v308_v0, 0  ;;  %281 = vmatprep.mubr.msk.bf16.mxu0 %vm347_vm1, %v346_v1  ;;  %v310_v4 = vld [vmem:[%s445_s3] sm:$0xff]   ;;  %301 = vmatprep.mubr.msk.bf16.mxu1 %vm347_vm1, %v346_v1  ;;  %v52_v6 = vsel %vm44_vm0, %v309_v3, 0  ;;  %v311_v7 = vld [vmem:[%s445_s3 + $0x8] sm:$0xff]  }
   0x3   :  { %278 = vmatpush3.bf16.xpose.msra.mxu0 %v49_v2  ;;  %v164_v5 = vsel %vm159_vm2, %v310_v4, 0  ;;  %v167_v8 = vsel %vm159_vm2, %v311_v7, 0 }
   0x4   :  { %279 = vmatprep.subr.bf16.mxu0 %v346_v1  ;;  %286 = vmatpush3.bf16.xpose.msra.mxu1 %v164_v5 }
   0x5   :  { %287 = vmatprep.subr.bf16.mxu1 %v346_v1 }
   0xb   :  { %280 = vmatpush3.bf16.xpose.msra.mxu0 %v52_v6 }
   0xc   :  { %10 = vsyncpa [#allocation3], 0  ;;  %288 = vmatpush3.bf16.xpose.msra.mxu1 %v167_v8  ;;  %v22_v9 = vld [vmem:[%s442_s0] sm:$0xf]  ;;  %v312_v10 = vld [vmem:[%s445_s3 + $0x10] sm:$0xff]  }
   0xd   :  { %289 = vmatprep.subr.bf16.mxu1 %v346_v1  ;;  %v170_v11 = vsel %vm159_vm2, %v312_v10, 0  ;;  %v313_v12 = vld [vmem:[%s445_s3 + $0x18] sm:$0xff]   ;;  %v314_v14 = vld [vmem:[%s445_s3 + $0x20] sm:$0xff]   ;;  %v315_v16 = vld [vmem:[%s445_s3 + $0x28] sm:$0xff]  }
   0xe   :  { %v173_v13 = vsel %vm159_vm2, %v313_v12, 0  ;;  %v176_v15 = vsel %vm159_vm2, %v314_v14, 0  ;;  %v179_v17 = vsel %vm159_vm2, %v315_v16, 0  ;;  %v316_v18 = vld [vmem:[%s445_s3 + $0x30] sm:$0xff]   ;;  %v317_v20 = vld [vmem:[%s445_s3 + $0x38] sm:$0xff]  }
   0xf   :  { %v182_v19 = vsel %vm159_vm2, %v316_v18, 0  ;;  %v185_v21 = vsel %vm159_vm2, %v317_v20, 0  ;;  %v251_v22 = vld [vmem:[%s444_s2] ss:$0 sm:$0xff]  ;;  %s348_s2 = smov [#allocation2]  }
  0x10   :  { %v255_v30 = vld [vmem:[%s446_s4] ss:$0 sm:$0xff]  ;;  %s243_s3 = sshll.u32 %s348_s2, 4  ;;  %s244_s3 = int_to_ptr.vmem [resolvable:$true] %s243_s3 }
  0x11   :  { %s322_s4 = scalar_lea.vmem %s244_s3, 128  ;;  %p327_p1 = scmp.lt.s32.totalorder %s244_s3, %s244_s3 }
  0x12   :  { %282 = vmatmul.mubr.msk.bf16.vlgmr.msra.gmra.mrb[0].mxu0 %vm44_vm0, %v22_v9  ;;  %p323_p0 = scmp.ne.s32.totalorder %s244_s3, %s322_s4  ;;  %p328_p2 = scmp.lt.s32.totalorder %s322_s4, %s322_s4 }
  0x14   :  { %290 = vmatpush3.bf16.xpose.msra.mxu1 %v170_v11  ;;  %p329_p3 = por %p328_p2, %p327_p1 }
  0x15   :  { %291 = vmatprep.subr.bf16.mxu1 %v346_v1 }
  0x16   :  { %p330_p4 = pnand %p329_p3, %p323_p0 }
  0x1c   :  { %292 = vmatpush3.bf16.xpose.msra.mxu1 %v173_v13 }
  0x1d   :  { %293 = vmatprep.subr.bf16.mxu1 %v346_v1 }
  0x24   :  { %294 = vmatpush3.bf16.xpose.msra.mxu1 %v176_v15 }
  0x25   :  { %295 = vmatprep.subr.bf16.mxu1 %v346_v1 }
  0x2c   :  { %296 = vmatpush3.bf16.xpose.msra.mxu1 %v179_v17 }
  0x2d   :  { %297 = vmatprep.subr.bf16.mxu1 %v346_v1 }
  0x34   :  { %298 = vmatpush3.bf16.xpose.msra.mxu1 %v182_v19 }
  0x35   :  { %299 = vmatprep.subr.bf16.mxu1 %v346_v1 }
  0x3c   :  { %300 = vmatpush3.bf16.xpose.msra.mxu1 %v185_v21 }
  0xe5   :  { %v88_v23 = vpop.f32.mrb[0].mxu0 }
  0xe6   :  { %v89_v24 = vadd.f32 %v251_v22, %v88_v23  ;;  %v283_v25 = vpop.f32.mrb[1].mxu0 }
  0xe7   :  { %v91_v26 = vpop.f32.mrb[2].mxu0 }
  0xe8   :  { %v94_v27 = vmax.f32 %v89_v24, 0.0  ;;  %v284_v28 = vpop.f32.mrb[3].mxu0 }
  0xea   :  { %v95_v29 = vpack.c.bf16 %v94_v27, %v94_v27 }
  0xec   :  { %302 = vmatmul.mubr.msk.bf16.vlgmr.msra.gmra.mrb[0].mxu1 %vm159_vm2, %v95_v29 }
 0x1bf   :  { %v221_v31 = vpop.f32.mrb[0].mxu1 }
 0x1c0   :  { %v222_v32 = vadd.f32 %v255_v30, %v221_v31  ;;  %v303_v33 = vpop.f32.mrb[1].mxu1 }
 0x1c1   :  { %v224_v34 = vpop.f32.mrb[2].mxu1 }
 0x1c2   :  { %227 = vmax.xlane.f32.xlu0 %v222_v32  ;;  %v304_v35 = vpop.f32.mrb[3].mxu1 }
 0x24f   :  { %v228_v36 = vpop.xlane.xlu0 %227 }
 0x250   :  { %v229_v37 = vsub.f32 %v222_v32, %v228_v36 }
 0x252   :  { %v230_v38 = vmul.f32 1.442695, %v229_v37 }
 0x254   :  { %318 = vpow2.f32 %v230_v38 }
 0x25e   :  { %v319_v39 = vpop.eup %318 }
 0x25f   :  { %232 = vadd.xlane.f32.xlu0 %v319_v39 }
 0x2ec   :  { %v233_v40 = vpop.xlane.xlu0 %232 }
 0x2ed   :  { %320 = vrcp.f32 %v233_v40 }
 0x2f7   :  { %v321_v41 = vpop.eup %320 }
 0x2f8   :  { %v235_v42 = vmul.f32 %v321_v41, %v319_v39 }
 0x2fa   :  { %236 = vst [vmem:[#allocation2] sm:$0xff] %v235_v42 }
 0x2fb   :  { %333 = shalt.err (!%p330_p4)
}
 0x2fc   :  { %s334_s19 = scalar_lea.hbm %s447_s5, 128 }
 0x2fd   :  { %p335_p5 = scmp.ne.s32.totalorder %s447_s5, %s334_s19  ;;  %p338_p6 = scmp.lt.u32.totalorder %s334_s19, %s447_s5 }
 0x2ff   :  { %p340_p7 = pnand %p338_p6, %p335_p5 }
 0x301   :  { %343 = shalt.err (!%p340_p7)
}
 0x302   :  { %246 = dma.vmem_to_hbm [thread:$0]  %s244_s3, 128, %s447_s5, [#allocation3]  }
 0x303   :  { %344 = dma.done.wait [#allocation3], 128  }
 0x304   :  { %345 = vsyncadd [#allocation3], 4294967168 }
 0x305   :  { %250 = vsyncpa [#allocation3], 1 }

</bundles_post_ra>
